<compile_context>
chip_gen: v6e
topology: v6e:2x2x1
jax: 0.10.0
libtpu: 0.0.40
codegen_flags: <defaults>
</compile_context>

<pallas_src>
import functools

import jax
import jax.numpy as jnp
from jax.experimental import pallas as pl
from jax.experimental.pallas import tpu as pltpu


def _round_up(x, m):
    return ((x + m - 1) // m) * m


def _choose_tiles(N, row_req, k_req):
    """Pick 128-aligned (row_tile, k_tile) and the padded node dimension."""
    n128 = _round_up(N, 128)

    row_tile = max(128, min(_round_up(row_req, 128), n128))
    if n128 >= 256:
        # Keep at least two row tiles so the "parallel" axis can shard across
        # v7x's two TensorCores.
        row_tile = min(row_tile, max(128, ((n128 // 2) // 128) * 128))

    k_tile = max(128, min(_round_up(k_req, 128), n128))

    # Make the larger tile a multiple of the smaller one so a single padded
    # node dimension divides both exactly.
    if k_tile >= row_tile:
        k_tile = max(row_tile, (k_tile // row_tile) * row_tile)
    else:
        row_tile = max(k_tile, (row_tile // k_tile) * k_tile)

    n_pad = _round_up(n128, max(row_tile, k_tile))

    # Don't let padding blow up the N^2 support matrix for small graphs.
    if n_pad * n_pad > (n128 * n128 * 5) // 4:
        row_tile = k_tile = 128
        n_pad = n128
    return n_pad, row_tile, k_tile


# ---------------------------------------------------------------------------
# Pass 2 kernels:  out = relu(support @ HW + b)
#   grid = (row tiles [parallel], K tiles [arbitrary]); f32 VMEM accumulator;
#   bias folded into the accumulator init at k == 0.
# ---------------------------------------------------------------------------
def _agg_kernel_resident(k_tile, s_ref, hw_ref, b_ref, o_ref, acc_ref):
    """HW is fully VMEM-resident; slice the K window inside the kernel."""
    k = pl.program_id(1)

    @pl.when(k == 0)
    def _init():
        acc_ref[...] = jnp.broadcast_to(b_ref[...], acc_ref.shape)

    start = pl.multiple_of(k * k_tile, k_tile)
    acc_ref[...] += jnp.dot(s_ref[...], hw_ref[pl.ds(start, k_tile), :],
                            preferred_element_type=jnp.float32)

    @pl.when(k == pl.num_programs(1) - 1)
    def _fin():
        o_ref[...] = jnp.maximum(acc_ref[...], 0.0).astype(o_ref.dtype)


def _agg_kernel_tiled(s_ref, hw_ref, b_ref, o_ref, acc_ref):
    """Fallback when HW is too large to keep resident: HW is K-tiled via BlockSpec."""
    k = pl.program_id(1)

    @pl.when(k == 0)
    def _init():
        acc_ref[...] = jnp.broadcast_to(b_ref[...], acc_ref.shape)

    acc_ref[...] += jnp.dot(s_ref[...], hw_ref[...],
                            preferred_element_type=jnp.float32)

    @pl.when(k == pl.num_programs(1) - 1)
    def _fin():
        o_ref[...] = jnp.maximum(acc_ref[...], 0.0).astype(o_ref.dtype)


def gcn_layer(H, support, weight, bias, *, row_tile=512, k_tile=1024,
              stream_dtype=jnp.bfloat16, hw_resident_bytes=16 << 20):
    """Pallas GCNLayer.forward(H, support).

    weight: [out_features, in_features] (nn.Linear layout), bias: [out_features].
    stream_dtype: dtype used for the HBM-streamed support / HW operands
    (accumulation is always f32).  Use jnp.float32 for bit-tight checks.
    """
    N, f_in = H.shape
    f_out, f_in_w = weight.shape
    assert f_in_w == f_in
    assert support.shape == (N, N)
    out_dtype = H.dtype
    stream_dtype = jnp.dtype(stream_dtype)

    f_out_p = _round_up(f_out, 128)
    n_pad, row_tile, k_tile = _choose_tiles(N, row_tile, k_tile)

    # ---- Pass 1 (tiny, left to XLA): HW = H @ W^T, cast straight to stream dtype.
    hw = jnp.dot(H, weight.T, preferred_element_type=jnp.float32,
                 precision="highest")
    HWp = jnp.zeros((n_pad, f_out_p), stream_dtype)
    HWp = HWp.at[:N, :f_out].set(hw.astype(stream_dtype))

    # ---- support: pad + cast in a single pass, directly in the stream dtype.
    if (N, N) == (n_pad, n_pad) and support.dtype == stream_dtype:
        Sp = support
    else:
        Sp = jnp.zeros((n_pad, n_pad), stream_dtype)
        Sp = Sp.at[:N, :N].set(support.astype(stream_dtype))

    bp = jnp.zeros((1, f_out_p), jnp.float32).at[0, :f_out].set(
        bias.astype(jnp.float32))

    s_item = Sp.dtype.itemsize
    hw_item = HWp.dtype.itemsize
    o_item = jnp.dtype(out_dtype).itemsize
    hw_bytes = n_pad * f_out_p * hw_item
    resident = hw_bytes <= hw_resident_bytes

    if resident:
        kernel = functools.partial(_agg_kernel_resident, k_tile)
        hw_spec = pl.BlockSpec((n_pad, f_out_p), lambda i, k: (0, 0),
                               pipeline_mode=pl.Buffered(1))
        est = (2 * row_tile * k_tile * s_item        # support (double-buffered)
               + hw_bytes                            # resident HW (single buffer)
               + 2 * f_out_p * 4                     # bias
               + 2 * row_tile * f_out_p * o_item     # out (double-buffered)
               + row_tile * f_out_p * 4)             # f32 accumulator
    else:
        kernel = _agg_kernel_tiled
        hw_spec = pl.BlockSpec((k_tile, f_out_p), lambda i, k: (k, 0))
        est = (2 * row_tile * k_tile * s_item
               + 2 * k_tile * f_out_p * hw_item
               + 2 * f_out_p * 4
               + 2 * row_tile * f_out_p * o_item
               + row_tile * f_out_p * 4)

    vmem_limit = int(min(est + (16 << 20), 48 << 20))

    out_p = pl.pallas_call(
        kernel,
        out_shape=jax.ShapeDtypeStruct((n_pad, f_out_p), out_dtype),
        grid_spec=pltpu.PrefetchScalarGridSpec(
            num_scalar_prefetch=0,
            grid=(n_pad // row_tile, n_pad // k_tile),
            in_specs=[
                pl.BlockSpec((row_tile, k_tile), lambda i, k: (i, k)),   # support
                hw_spec,                                                 # HW
                pl.BlockSpec((1, f_out_p), lambda i, k: (0, 0)),         # bias
            ],
            out_specs=pl.BlockSpec((row_tile, f_out_p), lambda i, k: (i, 0)),
            scratch_shapes=[pltpu.VMEM((row_tile, f_out_p), jnp.float32)],
        ),
        compiler_params=pltpu.CompilerParams(
            dimension_semantics=("parallel", "arbitrary"),
            vmem_limit_bytes=vmem_limit),
    )(Sp, HWp, bp)

    return out_p[:N, :f_out]


def gcn_reference(H, support, weight, bias):
    agg = jnp.dot(support, H, precision="highest")
    return jnp.maximum(jnp.dot(agg, weight.T, precision="highest") + bias, 0.0)


if __name__ == "__main__":
    # Small but non-trivial: N, f_in, f_out all unaligned (exercises padding),
    # multiple row tiles (exercises the accumulator / parallel-axis path).
    N, f_in, f_out = 300, 200, 72
    key = jax.random.PRNGKey(0)
    k_h, k_s, k_w, k_b = jax.random.split(key, 4)

    H = jax.random.normal(k_h, (N, f_in), dtype=jnp.float32)
    # symmetric row-normalized "support" (dense normalized adjacency)
    A = jax.random.uniform(k_s, (N, N), dtype=jnp.float32)
    A = 0.5 * (A + A.T) + jnp.eye(N, dtype=jnp.float32)
    support = A / jnp.sum(A, axis=-1, keepdims=True)

    # nn.Linear(in_features, out_features): weight [out, in], bias [out]
    bound = 1.0 / jnp.sqrt(jnp.float32(f_in))
    weight = jax.random.uniform(k_w, (f_out, f_in), jnp.float32, -bound, bound)
    bias = jax.random.uniform(k_b, (f_out,), jnp.float32, -bound, bound)

    ref = gcn_reference(H, support, weight, bias)

    layer = jax.jit(gcn_layer,
                    static_argnames=("row_tile", "k_tile", "stream_dtype",
                                     "hw_resident_bytes"))

    # f32 streams: tight numerical check of the kernel structure itself.
    out_f32 = jax.block_until_ready(
        layer(H, support, weight, bias, stream_dtype=jnp.float32))
    assert out_f32.shape == (N, f_out)
    err_f32 = float(jnp.max(jnp.abs(out_f32 - ref)))
    assert jnp.allclose(out_f32, ref, atol=5e-4, rtol=1e-3), err_f32

    # Default production path: bf16 streams, f32 accumulation (expected bf16
    # rounding of the streamed operands -> looser tolerance).
    out_bf16 = jax.block_until_ready(layer(H, support, weight, bias))
    assert out_bf16.shape == (N, f_out)
    err_bf16 = float(jnp.max(jnp.abs(out_bf16 - ref)))
    assert jnp.allclose(out_bf16, ref, atol=2e-2, rtol=2e-2), err_bf16

    print("KERNEL_OK")
</pallas_src>

<mosaic_0001>
module attributes {stable_mosaic.version = 11 : i64} {
  func.func @_agg_kernel_resident(%arg0: i32, %arg1: i32, %arg2: memref<128x384xf32, #tpu.memory_space<vmem>>, %arg3: memref<384x128xf32, #tpu.memory_space<vmem>>, %arg4: memref<1x128xf32, #tpu.memory_space<vmem>>, %arg5: memref<128x128xf32, #tpu.memory_space<vmem>>, %arg6: memref<128x128xf32, #tpu.memory_space<vmem>>) attributes {dimension_semantics = [#tpu.dimension_semantics<parallel>, #tpu.dimension_semantics<arbitrary>], iteration_bounds = array<i64: 3, 1>, scalar_prefetch = 0 : i64, scratch_operands = 1 : i64, tpu.core_type = #tpu.core_type<tc>, window_params = [{transform_indices = @transform_0, window_bounds = array<i64: 128, 384>}, {pipeline_mode = #tpu.pipeline_mode<synchronous>, transform_indices = @transform_1, window_bounds = array<i64: 384, 128>}, {pipeline_mode = #tpu.pipeline_mode<synchronous>, transform_indices = @transform_2, window_bounds = array<i64: 1, 128>}, {transform_indices = @transform_3, window_bounds = array<i64: 128, 128>}]} {
    %c0_i32 = arith.constant 0 : i32
    %0 = arith.cmpi eq, %arg1, %c0_i32 : i32
    %1 = arith.extui %0 : i1 to i32
    %c0_i32_0 = arith.constant 0 : i32
    %2 = arith.cmpi ne, %1, %c0_i32_0 : i32
    scf.if %2 {
      %c0_9 = arith.constant 0 : index
      %c0_10 = arith.constant 0 : index
      %15 = vector.load %arg4[%c0_9, %c0_10] : memref<1x128xf32, #tpu.memory_space<vmem>>, vector<1x128xf32>
      %16 = vector.shape_cast %15 : vector<1x128xf32> to vector<1x128xf32>
      %17 = vector.broadcast %16 : vector<1x128xf32> to vector<128x128xf32>
      %c0_11 = arith.constant 0 : index
      %c0_12 = arith.constant 0 : index
      %18 = vector.load %arg6[%c0_11, %c0_12] : memref<128x128xf32, #tpu.memory_space<vmem>>, vector<128x128xf32>
      tpu.vector_store %arg6[%c0_11, %c0_12], %17 {strides = array<i32>} : memref<128x128xf32, #tpu.memory_space<vmem>>, vector<128x128xf32>,
    } else {
    }
    %c384_i32 = arith.constant 384 : i32
    %3 = arith.muli %arg1, %c384_i32 : i32
    %4 = tpu.assume_multiple %3, 384 : i32
    %c0 = arith.constant 0 : index
    %c0_1 = arith.constant 0 : index
    %5 = vector.load %arg6[%c0, %c0_1] : memref<128x128xf32, #tpu.memory_space<vmem>>, vector<128x128xf32>
    %c0_2 = arith.constant 0 : index
    %c0_3 = arith.constant 0 : index
    %6 = vector.load %arg2[%c0_2, %c0_3] : memref<128x384xf32, #tpu.memory_space<vmem>>, vector<128x384xf32>
    %7 = arith.index_cast %4 : i32 to index
    %c0_4 = arith.constant 0 : index
    %8 = vector.load %arg3[%7, %c0_4] : memref<384x128xf32, #tpu.memory_space<vmem>>, vector<384x128xf32>
    %cst = arith.constant dense<0.000000e+00> : vector<128x128xf32>
    %9 = tpu.matmul %6, %8, %cst {dimension_numbers = #tpu.dot_dimension_numbers<[1], [0], [0], [1], [0, 0, 1, 1], [], []>} : vector<128x384xf32>, vector<384x128xf32>, vector<128x128xf32> -> vector<128x128xf32>
    %10 = arith.addf %5, %9 : vector<128x128xf32>
    %c0_5 = arith.constant 0 : index
    %c0_6 = arith.constant 0 : index
    %11 = vector.load %arg6[%c0_5, %c0_6] : memref<128x128xf32, #tpu.memory_space<vmem>>, vector<128x128xf32>
    tpu.vector_store %arg6[%c0_5, %c0_6], %10 {strides = array<i32>} : memref<128x128xf32, #tpu.memory_space<vmem>>, vector<128x128xf32>,
    %c0_i32_7 = arith.constant 0 : i32
    %12 = arith.cmpi eq, %arg1, %c0_i32_7 : i32
    %13 = arith.extui %12 : i1 to i32
    %c0_i32_8 = arith.constant 0 : i32
    %14 = arith.cmpi ne, %13, %c0_i32_8 : i32
    scf.if %14 {
      %c0_9 = arith.constant 0 : index
      %c0_10 = arith.constant 0 : index
      %15 = vector.load %arg6[%c0_9, %c0_10] : memref<128x128xf32, #tpu.memory_space<vmem>>, vector<128x128xf32>
      %cst_11 = arith.constant 0.000000e+00 : f32
      %16 = vector.broadcast %cst_11 : f32 to vector<128x128xf32>
      %17 = arith.maximumf %15, %16 : vector<128x128xf32>
      %c0_12 = arith.constant 0 : index
      %c0_13 = arith.constant 0 : index
      %18 = vector.load %arg5[%c0_12, %c0_13] : memref<128x128xf32, #tpu.memory_space<vmem>>, vector<128x128xf32>
      tpu.vector_store %arg5[%c0_12, %c0_13], %17 {strides = array<i32>} : memref<128x128xf32, #tpu.memory_space<vmem>>, vector<128x128xf32>,
    } else {
    }
    return
  }
  func.func @transform_0(%arg0: i32, %arg1: i32) -> (i32, i32) {
    %c0_i32 = arith.constant 0 : i32
    return %arg0, %arg1 : i32, i32
  }
  func.func @transform_1(%arg0: i32, %arg1: i32) -> (i32, i32) {
    %c0_i32 = arith.constant 0 : i32
    %c0_i32_0 = arith.constant 0 : i32
    %c0_i32_1 = arith.constant 0 : i32
    return %c0_i32, %c0_i32_0 : i32, i32
  }
  func.func @transform_2(%arg0: i32, %arg1: i32) -> (i32, i32) {
    %c0_i32 = arith.constant 0 : i32
    %c0_i32_0 = arith.constant 0 : i32
    %c0_i32_1 = arith.constant 0 : i32
    return %c0_i32, %c0_i32_0 : i32, i32
  }
  func.func @transform_3(%arg0: i32, %arg1: i32) -> (i32, i32) {
    %c0_i32 = arith.constant 0 : i32
    %c0_i32_0 = arith.constant 0 : i32
    return %arg0, %c0_i32 : i32, i32
  }
}

</mosaic_0001>

<bundles_post_ra>
// kernel: gcn_layer.1
= control target key start
LH: loop header
LB: loop body
LE: loop exit
PB: predicated region body
PF: predicated region fallthrough
CT: control target
= control target key end

     0   :  { %s1041_s12 = smov 0   ;;  %s1043_s13 = smov 0   ;;  %s1320_s0 = inlined_call_operand.vmem [shape: f32[384,384], index: 0, kind: input, shape index: {}]   ;;  %s1321_s1 = inlined_call_operand.vmem [shape: f32[384,128], index: 1, kind: input, shape index: {}]   ;;  %s1322_s2 = inlined_call_operand.vmem [shape: f32[1,128], index: 2, kind: input, shape index: {}]   ;;  %s1323_s3 = inlined_call_operand.vmem [shape: f32[384,128], index: 3, kind: output, shape index: {}]  }
   0x1   :  { %s1045_s14 = smov 0  }
   0x2 LB: > { %s25_s15 = sadd.s32 1, %s1015_s13  ;;  %p796_p0 = scmp.ge.s32.totalorder %s1019_s14, 1  ;;  %s1019_s14 = sphi %s1045_s14, %s13_s14   ;;  %s1015_s13 = sphi %s1043_s13, %s1326_s13   ;;  %s1011_s12 = sphi %s1041_s12, %s1325_s12  }
   0x3   : > { %p27_p1 = scmp.ge.s32.totalorder %s25_s15, 3  ;;  %p158_p2 = scmp.lt.s32.totalorder %s1019_s14, 4 }
   0x5   : > { %s1328_s15 = smov (%p27_p1, %s25_s15), 0  ;;  %p159_p3 = pnand %p796_p0, %p158_p2 }
   0x6   : > { %s797_s4 = sshll.u32 (!%p159_p3), %s1011_s12, 4 }
   0x7   : > { %162 = sbr.rel (%p159_p3) target bundleno = 309 (0x135), region = 32  ;;  %p1134_p4 = scmp.lt.s32.totalorder (!%p159_p3), %s797_s4, 47 }
   0xc   : > { %v329_v0 = vld [vmem:[%s1321_s1 + $0xf8] sm:$0xff]  ;;  %v328_v2 = vld [vmem:[%s1321_s1 + $0xf0] sm:$0xff]  ;;  %v327_v5 = vld [vmem:[%s1321_s1 + $0xe8] sm:$0xff]  ;;  %s1330_s4 = smov (!%p1134_p4, %s797_s4), 47 }
   0xd   : > { %v313_v1 = vld [vmem:[%s1321_s1 + $0x78] sm:$0xff]  ;;  %804 = vmatprep.subr.mxu0 %v329_v0  ;;  %v312_v4 = vld [vmem:[%s1321_s1 + $0x70] sm:$0xff]  ;;  %v311_v7 = vld [vmem:[%s1321_s1 + $0x68] sm:$0xff]  ;;  %s972_s20 = smul.u32 24, %s1330_s4  ;;  %s800_s27 = sshll.u32 %s1330_s4, 3 }
   0xe   : > { %v345_v3 = vld [vmem:[%s1321_s1 + $0x178] sm:$0xff]  ;;  %805 = vmatpush3.msra.mxu0 %v313_v1  ;;  %v344_v6 = vld [vmem:[%s1321_s1 + $0x170] sm:$0xff]  ;;  %v343_v8 = vld [vmem:[%s1321_s1 + $0x168] sm:$0xff]  ;;  %s1278_s30 = scalar_lea.vmem %s1323_s3, %s800_s27 }
   0xf   : > { %916 = vmatprep.subr.mxu1 %v345_v3  ;;  %806 = vmatprep.subr.mxu0 %v328_v2  ;;  %v326_v9 = vld [vmem:[%s1321_s1 + $0xe0] sm:$0xff]  ;;  %v325_v12 = vld [vmem:[%s1321_s1 + $0xd8] sm:$0xff]  ;;  %v324_v15 = vld [vmem:[%s1321_s1 + $0xd0] sm:$0xff]  ;;  %s1200_s9 = scalar_lea.vmem %s1320_s0, %s972_s20 }
  0x10   : > { %917 = vmatpush3.msra.mxu1 %v345_v3  ;;  %807 = vmatpush3.msra.mxu0 %v312_v4  ;;  %v310_v10 = vld [vmem:[%s1321_s1 + $0x60] sm:$0xff]  ;;  %v309_v13 = vld [vmem:[%s1321_s1 + $0x58] sm:$0xff]  ;;  %v308_v16 = vld [vmem:[%s1321_s1 + $0x50] sm:$0xff] }
  0x11   : > { %918 = vmatprep.subr.mxu1 %v344_v6  ;;  %808 = vmatprep.subr.mxu0 %v327_v5  ;;  %v342_v11 = vld [vmem:[%s1321_s1 + $0x160] sm:$0xff]  ;;  %v341_v14 = vld [vmem:[%s1321_s1 + $0x158] sm:$0xff]  ;;  %v340_v17 = vld [vmem:[%s1321_s1 + $0x150] sm:$0xff] }
  0x12   : > { %919 = vmatpush3.msra.mxu1 %v344_v6  ;;  %809 = vmatpush3.msra.mxu0 %v311_v7  ;;  %v323_v18 = vld [vmem:[%s1321_s1 + $0xc8] sm:$0xff]  ;;  %v322_v21 = vld [vmem:[%s1321_s1 + $0xc0] sm:$0xff]  ;;  %v321_v24 = vld [vmem:[%s1321_s1 + $0xb8] sm:$0xff] }
  0x13   : > { %920 = vmatprep.subr.mxu1 %v343_v8  ;;  %810 = vmatprep.subr.mxu0 %v326_v9  ;;  %v307_v19 = vld [vmem:[%s1321_s1 + $0x48] sm:$0xff]  ;;  %v306_v22 = vld [vmem:[%s1321_s1 + $0x40] sm:$0xff]  ;;  %v305_v25 = vld [vmem:[%s1321_s1 + $0x38] sm:$0xff] }
  0x14   : > { %921 = vmatpush3.msra.mxu1 %v343_v8  ;;  %811 = vmatpush3.msra.mxu0 %v310_v10  ;;  %v339_v20 = vld [vmem:[%s1321_s1 + $0x148] sm:$0xff]  ;;  %v338_v23 = vld [vmem:[%s1321_s1 + $0x140] sm:$0xff]  ;;  %v337_v26 = vld [vmem:[%s1321_s1 + $0x138] sm:$0xff] }
  0x15   : > { %922 = vmatprep.subr.mxu1 %v342_v11  ;;  %812 = vmatprep.subr.mxu0 %v325_v12  ;;  %v320_v27 = vld [vmem:[%s1321_s1 + $0xb0] sm:$0xff]  ;;  %v319_v30 = vld [vmem:[%s1321_s1 + $0xa8] sm:$0xff]  ;;  %v318_v33 = vld [vmem:[%s1321_s1 + $0xa0] sm:$0xff] }
  0x16   : > { %923 = vmatpush3.msra.mxu1 %v342_v11  ;;  %813 = vmatpush3.msra.mxu0 %v309_v13  ;;  %v304_v28 = vld [vmem:[%s1321_s1 + $0x30] sm:$0xff]  ;;  %v303_v31 = vld [vmem:[%s1321_s1 + $0x28] sm:$0xff]  ;;  %v302_v34 = vld [vmem:[%s1321_s1 + $0x20] sm:$0xff] }
  0x17   : > { %924 = vmatprep.subr.mxu1 %v341_v14  ;;  %814 = vmatprep.subr.mxu0 %v324_v15  ;;  %v336_v29 = vld [vmem:[%s1321_s1 + $0x130] sm:$0xff]  ;;  %v335_v32 = vld [vmem:[%s1321_s1 + $0x128] sm:$0xff]  ;;  %v334_v35 = vld [vmem:[%s1321_s1 + $0x120] sm:$0xff] }
  0x18   : > { %925 = vmatpush3.msra.mxu1 %v341_v14  ;;  %815 = vmatpush3.msra.mxu0 %v308_v16  ;;  %v317_v36 = vld [vmem:[%s1321_s1 + $0x98] sm:$0xff]  ;;  %v316_v39 = vld [vmem:[%s1321_s1 + $0x90] sm:$0xff]  ;;  %v315_v42 = vld [vmem:[%s1321_s1 + $0x88] sm:$0xff] }
  0x19   : > { %926 = vmatprep.subr.mxu1 %v340_v17  ;;  %816 = vmatprep.subr.mxu0 %v323_v18  ;;  %v301_v37 = vld [vmem:[%s1321_s1 + $0x18] sm:$0xff]  ;;  %v300_v40 = vld [vmem:[%s1321_s1 + $0x10] sm:$0xff]  ;;  %v299_v43 = vld [vmem:[%s1321_s1 + $0x8] sm:$0xff] }
  0x1a   : > { %927 = vmatpush3.msra.mxu1 %v340_v17  ;;  %817 = vmatpush3.msra.mxu0 %v307_v19  ;;  %v333_v38 = vld [vmem:[%s1321_s1 + $0x118] sm:$0xff]  ;;  %v332_v41 = vld [vmem:[%s1321_s1 + $0x110] sm:$0xff]  ;;  %v331_v44 = vld [vmem:[%s1321_s1 + $0x108] sm:$0xff] }
  0x1b   : > { %928 = vmatprep.subr.mxu1 %v339_v20  ;;  %818 = vmatprep.subr.mxu0 %v322_v21  ;;  %v314_v45 = vld [vmem:[%s1321_s1 + $0x80] sm:$0xff]  ;;  %v250_v46 = vld [vmem:[%s1200_s9 + $0x8] sm:$0xff]  ;;  %v251_v50 = vld [vmem:[%s1200_s9 + $0x10] sm:$0xff] }
  0x1c   : > { %929 = vmatpush3.msra.mxu1 %v339_v20  ;;  %819 = vmatpush3.msra.mxu0 %v306_v22  ;;  %v298_v47 = vld [vmem:[%s1321_s1] sm:$0xff]  ;;  %v254_v51 = vld [vmem:[%s1200_s9 + $0x28] sm:$0xff]  ;;  %v252_v54 = vld [vmem:[%s1200_s9 + $0x18] sm:$0xff] }
  0x1d   : > { %930 = vmatprep.subr.mxu1 %v338_v23  ;;  %820 = vmatprep.subr.mxu0 %v321_v24  ;;  %v249_v48 = vld [vmem:[%s1200_s9] sm:$0xff]  ;;  %v256_v55 = vld [vmem:[%s1200_s9 + $0x38] sm:$0xff]  ;;  %v263_v57 = vld [vmem:[%s1200_s9 + $0x70] sm:$0xff] }
  0x1e   : > { %931 = vmatpush3.msra.mxu1 %v338_v23  ;;  %821 = vmatpush3.msra.mxu0 %v305_v25  ;;  %v330_v49 = vld [vmem:[%s1321_s1 + $0x100] sm:$0xff]  ;;  %v260_v56 = vld [vmem:[%s1200_s9 + $0x58] sm:$0xff]  ;;  %v255_v58 = vld [vmem:[%s1200_s9 + $0x30] sm:$0xff] }
  0x1f   : > { %932 = vmatprep.subr.mxu1 %v337_v26  ;;  %822 = vmatprep.subr.mxu0 %v320_v27  ;;  %v253_v52 = vld [vmem:[%s1200_s9 + $0x20] sm:$0xff]  ;;  %v259_v59 = vld [vmem:[%s1200_s9 + $0x50] sm:$0xff]  ;;  %v266_v60 = vld [vmem:[%s1200_s9 + $0x88] sm:$0xff] }
  0x20   : > { %933 = vmatpush3.msra.mxu1 %v337_v26  ;;  %823 = vmatpush3.msra.mxu0 %v304_v28  ;;  %v257_v53 = vld [vmem:[%s1200_s9 + $0x40] sm:$0xff]  ;;  %v258_v62 = vld [vmem:[%s1200_s9 + $0x48] sm:$0xff]  ;;  %v272_v0 = vld [vmem:[%s1200_s9 + $0xb8] sm:$0xff] }
  0x21   : > { %934 = vmatprep.subr.mxu1 %v336_v29  ;;  %824 = vmatprep.subr.mxu0 %v319_v30  ;;  %v269_v61 = vld [vmem:[%s1200_s9 + $0xa0] sm:$0xff]  ;;  %v262_v63 = vld [vmem:[%s1200_s9 + $0x68] sm:$0xff]  ;;  %v275_v1 = vld [vmem:[%s1200_s9 + $0xd0] sm:$0xff] }
  0x22   : > { %935 = vmatpush3.msra.mxu1 %v336_v29  ;;  %825 = vmatpush3.msra.mxu0 %v303_v31  ;;  %v261_v2 = vld [vmem:[%s1200_s9 + $0x60] sm:$0xff]  ;;  %v278_v4 = vld [vmem:[%s1200_s9 + $0xe8] sm:$0xff]  ;;  %v264_v6 = vld [vmem:[%s1200_s9 + $0x78] sm:$0xff] }
  0x23   : > { %936 = vmatprep.subr.mxu1 %v335_v32  ;;  %826 = vmatprep.subr.mxu0 %v318_v33  ;;  %v265_v3 = vld [vmem:[%s1200_s9 + $0x80] sm:$0xff]  ;;  %v268_v7 = vld [vmem:[%s1200_s9 + $0x98] sm:$0xff]  ;;  %v287_v9 = vld [vmem:[%s1200_s9 + $0x130] sm:$0xff] }
  0x24   : > { %937 = vmatpush3.msra.mxu1 %v335_v32  ;;  %827 = vmatpush3.msra.mxu0 %v302_v34  ;;  %v281_v5 = vld [vmem:[%s1200_s9 + $0x100] sm:$0xff]  ;;  %v284_v8 = vld [vmem:[%s1200_s9 + $0x118] sm:$0xff]  ;;  %v267_v10 = vld [vmem:[%s1200_s9 + $0x90] sm:$0xff] }
  0x25   : > { %938 = vmatprep.subr.mxu1 %v334_v35  ;;  %828 = vmatprep.subr.mxu0 %v317_v36  ;;  %v271_v11 = vld [vmem:[%s1200_s9 + $0xb0] sm:$0xff]  ;;  %v290_v12 = vld [vmem:[%s1200_s9 + $0x148] sm:$0xff]  ;;  %v293_v13 = vld [vmem:[%s1200_s9 + $0x160] sm:$0xff] }
  0x26   : > { %939 = vmatpush3.msra.mxu1 %v334_v35  ;;  %829 = vmatpush3.msra.mxu0 %v301_v37  ;;  %v270_v14 = vld [vmem:[%s1200_s9 + $0xa8] sm:$0xff]  ;;  %v296_v16 = vld [vmem:[%s1200_s9 + $0x178] sm:$0xff]  ;;  %v273_v17 = vld [vmem:[%s1200_s9 + $0xc0] sm:$0xff] }
  0x27   : > { %940 = vmatprep.subr.mxu1 %v333_v38  ;;  %830 = vmatprep.subr.mxu0 %v316_v39  ;;  %v274_v15 = vld [vmem:[%s1200_s9 + $0xc8] sm:$0xff]  ;;  %v277_v18 = vld [vmem:[%s1200_s9 + $0xe0] sm:$0xff]  ;;  %v276_v19 = vld [vmem:[%s1200_s9 + $0xd8] sm:$0xff] }
  0x28   : > { %941 = vmatpush3.msra.mxu1 %v333_v38  ;;  %831 = vmatpush3.msra.mxu0 %v300_v40  ;;  %v280_v20 = vld [vmem:[%s1200_s9 + $0xf8] sm:$0xff]  ;;  %v279_v21 = vld [vmem:[%s1200_s9 + $0xf0] sm:$0xff]  ;;  %v282_v23 = vld [vmem:[%s1200_s9 + $0x108] sm:$0xff] }
  0x29   : > { %942 = vmatprep.subr.mxu1 %v332_v41  ;;  %832 = vmatprep.subr.mxu0 %v315_v42  ;;  %v283_v22 = vld [vmem:[%s1200_s9 + $0x110] sm:$0xff]  ;;  %v286_v24 = vld [vmem:[%s1200_s9 + $0x128] sm:$0xff]  ;;  %v285_v25 = vld [vmem:[%s1200_s9 + $0x120] sm:$0xff] }
  0x2a   : > { %943 = vmatpush3.msra.mxu1 %v332_v41  ;;  %833 = vmatpush3.msra.mxu0 %v299_v43  ;;  %v289_v26 = vld [vmem:[%s1200_s9 + $0x140] sm:$0xff]  ;;  %v288_v27 = vld [vmem:[%s1200_s9 + $0x138] sm:$0xff]  ;;  %v291_v29 = vld [vmem:[%s1200_s9 + $0x150] sm:$0xff] }
  0x2b   : > { %944 = vmatprep.subr.mxu1 %v331_v44  ;;  %834 = vmatprep.subr.mxu0 %v314_v45  ;;  %v292_v28 = vld [vmem:[%s1200_s9 + $0x158] sm:$0xff]  ;;  %v295_v30 = vld [vmem:[%s1200_s9 + $0x170] sm:$0xff]  ;;  %v294_v31 = vld [vmem:[%s1200_s9 + $0x168] sm:$0xff] }
  0x2c   : > { %410 = vmatprep.mubr.f32.mxu0 %v250_v46  ;;  %835 = vmatpush3.msra.mxu0 %v298_v47  ;;  %v1271_v37 = vld [vmem:[%s1322_s2] ss:$0 sm:$0xff] }
  0x2d   : > { %945 = vmatpush3.msra.mxu1 %v331_v44  ;;  %411 = vmatmul.mubr.f32.vlgmr.msra.gmra.mxu0 %v249_v48 }
  0x2e   : > { %946 = vmatprep.subr.mxu1 %v330_v49  ;;  %948 = vmatprep.mubr.f32.mxu1 %v251_v50 }
  0x2f   : > { %947 = vmatpush3.msra.mxu1 %v330_v49  ;;  %415 = vmatprep.mubr.f32.mxu0 %v253_v52 }
  0x30   : > { %949 = vmatmul.mubr.f32.vlgmr.msra.gmra.mxu1 %v254_v51 }
  0x31   : > { %951 = vmatprep.mubr.f32.mxu1 %v257_v53  ;;  %416 = vmatmul.mubr.f32.gmra.mxu0 %v252_v54 }
  0x32   : > { %420 = vmatprep.mubr.f32.mxu0 %v256_v55 }
  0x34   : > { %952 = vmatmul.mubr.f32.gmra.mxu1 %v260_v56 }
  0x35   : > { %954 = vmatprep.mubr.f32.mxu1 %v263_v57  ;;  %421 = vmatmul.mubr.f32.gmra.mxu0 %v255_v58 }
  0x36   : > { %425 = vmatprep.mubr.f32.mxu0 %v259_v59 }
  0x38   : > { %955 = vmatmul.mubr.f32.gmra.mxu1 %v266_v60 }
  0x39   : > { %957 = vmatprep.mubr.f32.mxu1 %v269_v61  ;;  %426 = vmatmul.mubr.f32.gmra.mxu0 %v258_v62 }
  0x3a   : > { %430 = vmatprep.mubr.f32.mxu0 %v262_v63 }
  0x3c   : > { %958 = vmatmul.mubr.f32.gmra.mxu1 %v272_v0 }
  0x3d   : > { %960 = vmatprep.mubr.f32.mxu1 %v275_v1  ;;  %431 = vmatmul.mubr.f32.gmra.mxu0 %v261_v2 }
  0x3e   : > { %435 = vmatprep.mubr.f32.mxu0 %v265_v3 }
  0x40   : > { %961 = vmatmul.mubr.f32.gmra.mxu1 %v278_v4 }
  0x41   : > { %963 = vmatprep.mubr.f32.mxu1 %v281_v5  ;;  %436 = vmatmul.mubr.f32.gmra.mxu0 %v264_v6 }
  0x42   : > { %440 = vmatprep.mubr.f32.mxu0 %v268_v7 }
  0x44   : > { %964 = vmatmul.mubr.f32.gmra.mxu1 %v284_v8 }
  0x45   : > { %966 = vmatprep.mubr.f32.mxu1 %v287_v9  ;;  %441 = vmatmul.mubr.f32.gmra.mxu0 %v267_v10 }
  0x46   : > { %445 = vmatprep.mubr.f32.mxu0 %v271_v11 }
  0x48   : > { %967 = vmatmul.mubr.f32.gmra.mxu1 %v290_v12 }
  0x49   : > { %969 = vmatprep.mubr.f32.mxu1 %v293_v13  ;;  %446 = vmatmul.mubr.f32.gmra.mxu0 %v270_v14 }
  0x4a   : > { %450 = vmatprep.mubr.f32.mxu0 %v274_v15 }
  0x4c   : > { %970 = vmatmul.mubr.f32.gmra.mxu1 %v296_v16 }
  0x4d   : > { %451 = vmatmul.mubr.f32.gmra.mxu0 %v273_v17 }
  0x4e   : > { %455 = vmatprep.mubr.f32.mxu0 %v277_v18 }
  0x51   : > { %456 = vmatmul.mubr.f32.gmra.mxu0 %v276_v19 }
  0x52   : > { %460 = vmatprep.mubr.f32.mxu0 %v280_v20 }
  0x55   : > { %461 = vmatmul.mubr.f32.gmra.mxu0 %v279_v21 }
  0x56   : > { %465 = vmatprep.mubr.f32.mxu0 %v283_v22 }
  0x59   : > { %466 = vmatmul.mubr.f32.gmra.mxu0 %v282_v23 }
  0x5a   : > { %470 = vmatprep.mubr.f32.mxu0 %v286_v24 }
  0x5d   : > { %471 = vmatmul.mubr.f32.gmra.mxu0 %v285_v25 }
  0x5e   : > { %475 = vmatprep.mubr.f32.mxu0 %v289_v26 }
  0x61   : > { %476 = vmatmul.mubr.f32.gmra.mxu0 %v288_v27 }
  0x62   : > { %480 = vmatprep.mubr.f32.mxu0 %v292_v28 }
  0x65   : > { %481 = vmatmul.mubr.f32.gmra.mxu0 %v291_v29 }
  0x66   : > { %485 = vmatprep.mubr.f32.mxu0 %v295_v30 }
  0x69   : > { %486 = vmatmul.mubr.f32.gmra.mxu0 %v294_v31 }
  0xed   : > { %v836_v32 = vpop.f32.mrf.mxu0 }
  0xef   : > { %v837_v33 = vpop.f32.mrf.mxu0 }
  0xf0   : > { %v950_v34 = vpop.f32.mrf.mxu1  ;;  %v838_v35 = vadd.f32 %v837_v33, %v836_v32 }
  0xf1   : > { %v839_v36 = vpop.f32.mrf.mxu0 }
  0xf2   : > { %v557_v38 = vpop.f32.mrf.mxu1 }
  0xf3   : > { %v558_v39 = vadd.f32 %v838_v35, %v557_v38  ;;  %v840_v40 = vpop.f32.mrf.mxu0 }
  0xf4   : > { %v953_v41 = vpop.f32.mrf.mxu1  ;;  %v841_v43 = vadd.f32 %v840_v40, %v839_v36 }
  0xf5   : > { %v636_v42 = vadd.f32 %v1271_v37, %v558_v39  ;;  %v842_v44 = vpop.f32.mrf.mxu0 }
  0xf6   : > { %v563_v46 = vadd.f32 %v950_v34, %v841_v43  ;;  %v567_v48 = vpop.f32.mrf.mxu1 }
  0xf7   : > { %v687_v45 = vmax.f32 %v636_v42, 0.0  ;;  %v843_v47 = vpop.f32.mrf.mxu0 }
  0xf8   : > { %v637_v49 = vadd.f32 %v1271_v37, %v563_v46  ;;  %v844_v50 = vadd.f32 %v843_v47, %v842_v44  ;;  %v956_v55 = vpop.f32.mrf.mxu1 }
  0xf9   : > { %703 = vst [vmem:[%s1278_s30] sm:$0xff] %v687_v45  ;;  %v845_v51 = vpop.f32.mrf.mxu0 }
  0xfa   : > { %v688_v52 = vmax.f32 %v637_v49, 0.0  ;;  %v568_v53 = vadd.f32 %v844_v50, %v567_v48  ;;  %v577_v62 = vpop.f32.mrf.mxu1 }
  0xfb   : > { %v846_v54 = vpop.f32.mrf.mxu0 }
  0xfc   : > { %704 = vst [vmem:[%s1278_s30 + $0x8] sm:$0xff] %v688_v52  ;;  %v638_v56 = vadd.f32 %v1271_v37, %v568_v53  ;;  %v847_v57 = vadd.f32 %v846_v54, %v845_v51  ;;  %v959_v5 = vpop.f32.mrf.mxu1 }
  0xfd   : > { %v848_v58 = vpop.f32.mrf.mxu0 }
  0xfe   : > { %v689_v59 = vmax.f32 %v638_v56, 0.0  ;;  %v573_v60 = vadd.f32 %v953_v41, %v847_v57  ;;  %v587_v12 = vpop.f32.mrf.mxu1 }
  0xff   : > { %v849_v61 = vpop.f32.mrf.mxu0 }
 0x100   : > { %705 = vst [vmem:[%s1278_s30 + $0x10] sm:$0xff] %v689_v59  ;;  %v639_v63 = vadd.f32 %v1271_v37, %v573_v60  ;;  %v850_v0 = vadd.f32 %v849_v61, %v848_v58  ;;  %v962_v19 = vpop.f32.mrf.mxu1 }
 0x101   : > { %v851_v1 = vpop.f32.mrf.mxu0 }
 0x102   : > { %v690_v2 = vmax.f32 %v639_v63, 0.0  ;;  %v578_v3 = vadd.f32 %v850_v0, %v577_v62  ;;  %v597_v26 = vpop.f32.mrf.mxu1 }
 0x103   : > { %v852_v4 = vpop.f32.mrf.mxu0 }
 0x104   : > { %706 = vst [vmem:[%s1278_s30 + $0x18] sm:$0xff] %v690_v2  ;;  %v640_v6 = vadd.f32 %v1271_v37, %v578_v3  ;;  %v853_v7 = vadd.f32 %v852_v4, %v851_v1  ;;  %v965_v33 = vpop.f32.mrf.mxu1 }
 0x105   : > { %v854_v8 = vpop.f32.mrf.mxu0 }
 0x106   : > { %v691_v9 = vmax.f32 %v640_v6, 0.0  ;;  %v583_v10 = vadd.f32 %v956_v55, %v853_v7  ;;  %v607_v41 = vpop.f32.mrf.mxu1 }
 0x107   : > { %v855_v11 = vpop.f32.mrf.mxu0 }
 0x108   : > { %707 = vst [vmem:[%s1278_s30 + $0x20] sm:$0xff] %v691_v9  ;;  %v641_v13 = vadd.f32 %v1271_v37, %v583_v10  ;;  %v856_v14 = vadd.f32 %v855_v11, %v854_v8  ;;  %v968_v48 = vpop.f32.mrf.mxu1 }
 0x109   : > { %v857_v15 = vpop.f32.mrf.mxu0 }
 0x10a   : > { %v692_v16 = vmax.f32 %v641_v13, 0.0  ;;  %v588_v17 = vadd.f32 %v856_v14, %v587_v12  ;;  %v617_v55 = vpop.f32.mrf.mxu1 }
 0x10b   : > { %v858_v18 = vpop.f32.mrf.mxu0 }
 0x10c   : > { %708 = vst [vmem:[%s1278_s30 + $0x28] sm:$0xff] %v692_v16  ;;  %v642_v20 = vadd.f32 %v1271_v37, %v588_v17  ;;  %v859_v21 = vadd.f32 %v858_v18, %v857_v15  ;;  %v971_v62 = vpop.f32.mrf.mxu1 }
 0x10d   : > { %v860_v22 = vpop.f32.mrf.mxu0 }
 0x10e   : > { %v693_v23 = vmax.f32 %v642_v20, 0.0  ;;  %v593_v24 = vadd.f32 %v959_v5, %v859_v21  ;;  %v627_v5 = vpop.f32.mrf.mxu1 }
 0x10f   : > { %v861_v25 = vpop.f32.mrf.mxu0 }
 0x110   : > { %709 = vst [vmem:[%s1278_s30 + $0x30] sm:$0xff] %v693_v23  ;;  %v643_v27 = vadd.f32 %v1271_v37, %v593_v24  ;;  %v862_v28 = vadd.f32 %v861_v25, %v860_v22 }
 0x111   : > { %v863_v29 = vpop.f32.mrf.mxu0 }
 0x112   : > { %v694_v30 = vmax.f32 %v643_v27, 0.0  ;;  %v598_v31 = vadd.f32 %v862_v28, %v597_v26 }
 0x113   : > { %v864_v32 = vpop.f32.mrf.mxu0 }
 0x114   : > { %710 = vst [vmem:[%s1278_s30 + $0x38] sm:$0xff] %v694_v30  ;;  %v644_v34 = vadd.f32 %v1271_v37, %v598_v31  ;;  %v865_v35 = vadd.f32 %v864_v32, %v863_v29 }
 0x115   : > { %v866_v36 = vpop.f32.mrf.mxu0 }
 0x116   : > { %v695_v38 = vmax.f32 %v644_v34, 0.0  ;;  %v603_v39 = vadd.f32 %v962_v19, %v865_v35 }
 0x117   : > { %v867_v40 = vpop.f32.mrf.mxu0 }
 0x118   : > { %711 = vst [vmem:[%s1278_s30 + $0x40] sm:$0xff] %v695_v38  ;;  %v645_v42 = vadd.f32 %v1271_v37, %v603_v39  ;;  %v868_v43 = vadd.f32 %v867_v40, %v866_v36 }
 0x119   : > { %v869_v44 = vpop.f32.mrf.mxu0 }
 0x11a   : > { %v696_v45 = vmax.f32 %v645_v42, 0.0  ;;  %v608_v46 = vadd.f32 %v868_v43, %v607_v41 }
 0x11b   : > { %v870_v47 = vpop.f32.mrf.mxu0 }
 0x11c   : > { %712 = vst [vmem:[%s1278_s30 + $0x48] sm:$0xff] %v696_v45  ;;  %v646_v49 = vadd.f32 %v1271_v37, %v608_v46  ;;  %v871_v50 = vadd.f32 %v870_v47, %v869_v44 }
 0x11d   : > { %v872_v51 = vpop.f32.mrf.mxu0 }
 0x11e   : > { %v697_v52 = vmax.f32 %v646_v49, 0.0  ;;  %v613_v53 = vadd.f32 %v965_v33, %v871_v50 }
 0x11f   : > { %v873_v54 = vpop.f32.mrf.mxu0 }
 0x120   : > { %713 = vst [vmem:[%s1278_s30 + $0x50] sm:$0xff] %v697_v52  ;;  %v647_v56 = vadd.f32 %v1271_v37, %v613_v53  ;;  %v874_v57 = vadd.f32 %v873_v54, %v872_v51 }
 0x121   : > { %v875_v58 = vpop.f32.mrf.mxu0 }
 0x122   : > { %v698_v59 = vmax.f32 %v647_v56, 0.0  ;;  %v618_v60 = vadd.f32 %v874_v57, %v617_v55 }
 0x123   : > { %v876_v61 = vpop.f32.mrf.mxu0 }
 0x124   : > { %714 = vst [vmem:[%s1278_s30 + $0x58] sm:$0xff] %v698_v59  ;;  %v648_v63 = vadd.f32 %v1271_v37, %v618_v60  ;;  %v877_v0 = vadd.f32 %v876_v61, %v875_v58 }
 0x125   : > { %v878_v1 = vpop.f32.mrf.mxu0 }
 0x126   : > { %v699_v2 = vmax.f32 %v648_v63, 0.0  ;;  %v623_v3 = vadd.f32 %v968_v48, %v877_v0 }
 0x127   : > { %v879_v4 = vpop.f32.mrf.mxu0 }
 0x128   : > { %715 = vst [vmem:[%s1278_s30 + $0x60] sm:$0xff] %v699_v2  ;;  %v649_v6 = vadd.f32 %v1271_v37, %v623_v3  ;;  %v880_v7 = vadd.f32 %v879_v4, %v878_v1 }
 0x129   : > { %v881_v8 = vpop.f32.mrf.mxu0 }
 0x12a   : > { %v700_v9 = vmax.f32 %v649_v6, 0.0  ;;  %v628_v10 = vadd.f32 %v880_v7, %v627_v5 }
 0x12b   : > { %v882_v11 = vpop.f32.mrf.mxu0 }
 0x12c   : > { %716 = vst [vmem:[%s1278_s30 + $0x68] sm:$0xff] %v700_v9  ;;  %v650_v12 = vadd.f32 %v1271_v37, %v628_v10  ;;  %v883_v13 = vadd.f32 %v882_v11, %v881_v8 }
 0x12e   : > { %v701_v14 = vmax.f32 %v650_v12, 0.0  ;;  %v633_v15 = vadd.f32 %v971_v62, %v883_v13 }
 0x130   : > { %717 = vst [vmem:[%s1278_s30 + $0x70] sm:$0xff] %v701_v14  ;;  %v651_v16 = vadd.f32 %v1271_v37, %v633_v15 }
 0x132   : > { %v702_v17 = vmax.f32 %v651_v16, 0.0 }
 0x134   : > { %718 = vst [vmem:[%s1278_s30 + $0x78] sm:$0xff] %v702_v17 }
 0x135 PF: > { %s13_s14 = sadd.s32 1, %s1019_s14   ;;  %s1325_s12 = smov %s1015_s13 }
 0x136   : > { %p10_p5 = scmp.ge.s32.totalorder %s13_s14, 5   ;;  %s1326_s13 = smov %s1328_s15 }
 0x138   :  { %12 = sbr.rel (!%p10_p5) target bundleno = 2 (0x2), region = 71 }

</bundles_post_ra>
